<compile_context>
chip_gen: v7x
topology: tpu7x:2x2x1
jax: 0.10.0
libtpu: 0.0.40
codegen_flags: <defaults>
</compile_context>

<pallas_src>
import math
import numpy as np
import jax
import jax.numpy as jnp
from jax import lax
from jax.experimental import pallas as pl
from jax.experimental.pallas import tpu as pltpu


MASK_BIAS = -1e30      # additive causal-mask value (large finite; no -inf -> NaN on exp)


# ------------------------------ tiling helpers -------------------------------

def _vmem_limit_bytes():
    """~80% of physical per-core VMEM (headroom for compiler scratch / pipeline buffers)."""
    try:
        cap = int(pltpu.get_tpu_info().vmem_capacity_bytes)
    except Exception:
        cap = 128 * 1024 * 1024            # v5e/v6e default if the query is unavailable
    return int(cap * 0.8)


def _pick_tile(qlen, max_tile=512):
    """Largest divisor of qlen that is a multiple of 8 and <= max_tile (falls back to qlen)."""
    best = qlen
    for cand in range(8, min(qlen, max_tile) + 1, 8):
        if qlen % cand == 0:
            best = cand
    return best


def _attn_q_tile(qlen, klen, n_head, vmem_limit):
    """Shrink the attention q-tile until ~3 live (n_head,tq,klen) f32 score temps fit the budget."""
    t = _pick_tile(qlen, 512)
    while t > 8 and 3 * n_head * t * klen * 4 > vmem_limit // 2:
        nt = t // 2
        if nt < 8 or qlen % nt != 0:
            break
        t = nt
    return t


def _check_causal_mask(attn_mask, qlen, klen):
    # The kernel regenerates the standard causal (triu, diagonal=1) additive mask in-kernel from
    # iota, so the attn_mask argument is only validated here, never streamed from HBM.
    if attn_mask is None:
        return
    try:
        am = np.asarray(jax.device_get(attn_mask)) > 0
    except Exception:
        return  # abstract/traced mask: assume the standard causal dec_attn_mask
    expected = np.triu(np.ones((qlen, klen), dtype=bool), k=1)
    if am.shape != (qlen, klen) or not np.array_equal(am, expected):
        # TODO(synk): 3-D (per-batch) / non-causal masks and the mems (klen > qlen) path.
        raise NotImplementedError(
            "only the standard 2-D causal dec_attn_mask (triu, k=1) is supported; "
            "the mask is regenerated in-kernel")


# ------------------------------ Pallas kernels -------------------------------

def _make_qkv_kernel(n_head, d_head):
    HD = n_head * d_head

    def kernel(x_ref, w_ref, q_ref, k_ref, v_ref):
        # x: (1, TQ, M) f32, w: (M, 3*HD) bf16 resident -> q/k/v head-major (1, N, TQ, D) bf16.
        x = x_ref[0].astype(jnp.bfloat16)
        y = jnp.dot(x, w_ref[...], preferred_element_type=jnp.float32).astype(jnp.bfloat16)
        for h in range(n_head):
            lo = h * d_head
            q_ref[0, h] = y[:, lo:lo + d_head]
            k_ref[0, h] = y[:, HD + lo:HD + lo + d_head]
            v_ref[0, h] = y[:, 2 * HD + lo:2 * HD + lo + d_head]

    return kernel


def _make_attn_out_ln_kernel(n_head, qlen, scale):
    """Fused: AC + (B_+D_) + in-VMEM rel-shift + causal mask + softmax + P@V + Wo + residual + LN."""
    nbits = (qlen - 1).bit_length()          # bits needed for per-row shifts in [0, qlen-1]

    def kernel(q_ref, k_ref, v_ref, rwb_ref, remb_ref, rbias_ref,
               res_ref, wo_ref, g_ref, b_ref, o_ref):
        t = pl.program_id(1)
        tq = q_ref.shape[2]
        klen = k_ref.shape[2]

        # --- per-tile index machinery, hoisted once (shared by mask + all rel-shift selects) ---
        row = lax.broadcasted_iota(jnp.int32, (tq, klen), 0) + t * tq     # absolute query row
        col = lax.broadcasted_iota(jnp.int32, (tq, klen), 1)
        mask_bias = jnp.where(col > row, MASK_BIAS, 0.0).astype(jnp.float32)  # in-kernel causal mask
        shift_amt = (qlen - 1) - row                                      # per-row left-roll amount
        bit_masks = [((shift_amt >> bit) & 1) == 1 for bit in range(nbits)]

        # --- fold 1/sqrt(d_head) into the (small) q operands; r_w_bias added in f32 ---
        q_f32 = q_ref[0].astype(jnp.float32)                              # (N, TQ, D)
        qrw = ((q_f32 + rwb_ref[...]) * scale).astype(jnp.bfloat16)
        q_s = (q_f32 * scale).astype(jnp.bfloat16)
        k_all = k_ref[0]                                                  # (N, K, D) bf16
        v_all = v_ref[0]                                                  # (N, K, D) bf16
        rbias = rbias_ref[...] * scale                                    # (N, K)    f32

        # --- content + positional scores, one head-batched MXU pass each ---
        ac = jnp.einsum('nqd,nkd->nqk', qrw, k_all, preferred_element_type=jnp.float32)
        bd = jnp.einsum('nqd,nkd->nqk', q_s, remb_ref[...], preferred_element_type=jnp.float32)
        bd = bd + rbias[:, None, :]

        # --- in-VMEM relative shift: bd[n,i,j] <- bd[n,i, j + (qlen-1) - abs_row(i)] ---
        # log2(qlen) masked cyclic lane rolls over the head-batched tensor; wrap-around only
        # lands on causally-masked entries (valid because klen == qlen and the mask is causal).
        # TODO(synk): single strided pltpu.roll (XLU) instead of the concat-based rolls.
        for bit in range(nbits):
            amt = 1 << bit
            rolled = jnp.concatenate([bd[:, :, amt:], bd[:, :, :amt]], axis=2)
            bd = jnp.where(bit_masks[bit], rolled, bd)

        # --- mask + softmax (denominator reciprocal on the EUP) ---
        score = ac + bd + mask_bias
        m = jnp.max(score, axis=-1, keepdims=True)
        e = jnp.exp(score - m)
        p = e * pl.reciprocal(jnp.sum(e, axis=-1, keepdims=True), approx=True)

        # --- P @ V (head-batched), then per-head Wo slabs accumulate straight into (TQ, M) ---
        pv = jnp.einsum('nqk,nkd->nqd', p.astype(v_all.dtype), v_all,
                        preferred_element_type=jnp.float32)               # (N, TQ, D)
        attn_out = jnp.dot(pv[0].astype(jnp.bfloat16), wo_ref[0],
                           preferred_element_type=jnp.float32)
        for h in range(1, n_head):
            attn_out = attn_out + jnp.dot(pv[h].astype(jnp.bfloat16), wo_ref[h],
                                          preferred_element_type=jnp.float32)

        # --- residual + LayerNorm (post-LN variant), lane-dense (TQ, d_model) writeback ---
        x = res_ref[0] + attn_out
        mu = jnp.mean(x, axis=-1, keepdims=True)
        var = jnp.mean(jnp.square(x - mu), axis=-1, keepdims=True)
        o_ref[0] = ((x - mu) * lax.rsqrt(var + 1e-5)) * g_ref[...] + b_ref[...]

    return kernel


# ------------------------------- glue / wrapper ------------------------------

def rel_learnable_mha(w, r_emb, r_w_bias, r_bias, attn_mask, params, n_head, d_head):
    qlen, bsz, d_model = w.shape
    klen = qlen                               # mems=None path.  TODO(synk): mems (klen > qlen).
    HD = n_head * d_head
    scale = 1.0 / math.sqrt(d_head)
    Wqkv, Wo, gamma, beta = params

    _check_causal_mask(attn_mask, qlen, klen)

    # r_emb / r_bias length handling (same branches as the torch forward)
    if klen > r_emb.shape[0]:
        pad = jnp.broadcast_to(r_emb[0:1], (klen - r_emb.shape[0],) + r_emb.shape[1:])
        r_emb = jnp.concatenate([pad, r_emb], axis=0)
        bpad = jnp.broadcast_to(r_bias[0:1], (klen - r_bias.shape[0],) + r_bias.shape[1:])
        r_bias = jnp.concatenate([bpad, r_bias], axis=0)
    else:
        r_emb = r_emb[-klen:]
        r_bias = r_bias[-klen:]

    vmem_limit = _vmem_limit_bytes()

    # Layout plumbing (one-time, outside the hot loop): batch-major activations, head-major
    # positional tables, bf16 MXU operands.
    wt = jnp.transpose(w, (1, 0, 2))                               # (B, Q, M) f32 (QKV in + residual)
    wqkv_bf = Wqkv.astype(jnp.bfloat16)                            # (M, 3*HD)
    wo_h = Wo.reshape(n_head, d_head, d_model).astype(jnp.bfloat16)
    remb = jnp.transpose(r_emb, (1, 0, 2)).astype(jnp.bfloat16)    # (N, K, D)
    rwb = r_w_bias.reshape(n_head, 1, d_head).astype(jnp.float32)  # (N, 1, D)
    rbias = jnp.transpose(r_bias, (1, 0)).astype(jnp.float32)      # (N, K)
    gam = gamma.reshape(1, d_model).astype(jnp.float32)
    bet = beta.reshape(1, d_model).astype(jnp.float32)

    # On v7x, 'parallel' axes are sharded across the 2 TensorCores; bsz leads so the grid balances
    # whenever bsz * n_tiles >= 2, and each core's 64 MiB VMEM sees only its own per-step blocks.
    cparams = pltpu.CompilerParams(
        dimension_semantics=("parallel", "parallel"),
        vmem_limit_bytes=vmem_limit)

    # ---- 1) QKV projection, head-major outputs: (B,Q,M) @ (M,3HD) -> q/k/v (B,N,Q,D) bf16 ----
    tq_p = _pick_tile(qlen, 512)
    grid_p = (bsz, qlen // tq_p)
    q, k, v = pl.pallas_call(
        _make_qkv_kernel(n_head, d_head),
        grid=grid_p,
        in_specs=[
            pl.BlockSpec((1, tq_p, d_model), lambda b, t: (b, t, 0)),
            pl.BlockSpec((d_model, 3 * HD), lambda b, t: (0, 0)),          # resident weights
        ],
        out_specs=(
            pl.BlockSpec((1, n_head, tq_p, d_head), lambda b, t: (b, 0, t, 0)),
            pl.BlockSpec((1, n_head, tq_p, d_head), lambda b, t: (b, 0, t, 0)),
            pl.BlockSpec((1, n_head, tq_p, d_head), lambda b, t: (b, 0, t, 0)),
        ),
        out_shape=(
            jax.ShapeDtypeStruct((bsz, n_head, qlen, d_head), jnp.bfloat16),
            jax.ShapeDtypeStruct((bsz, n_head, qlen, d_head), jnp.bfloat16),
            jax.ShapeDtypeStruct((bsz, n_head, qlen, d_head), jnp.bfloat16),
        ),
        compiler_params=cparams,
    )(wt, wqkv_bf)

    # ---- 2) fused attention: scores + rel-shift + in-kernel causal mask + softmax + P@V
    #         + out-proj + residual + LayerNorm, all heads per grid step ----------------------
    tq_a = _attn_q_tile(qlen, klen, n_head, vmem_limit)
    grid_a = (bsz, qlen // tq_a)
    out_bqm = pl.pallas_call(
        _make_attn_out_ln_kernel(n_head, qlen, scale),
        grid=grid_a,
        in_specs=[
            pl.BlockSpec((1, n_head, tq_a, d_head), lambda b, t: (b, 0, t, 0)),   # q tile
            pl.BlockSpec((1, n_head, klen, d_head), lambda b, t: (b, 0, 0, 0)),   # full K (per batch)
            pl.BlockSpec((1, n_head, klen, d_head), lambda b, t: (b, 0, 0, 0)),   # full V (per batch)
            pl.BlockSpec((n_head, 1, d_head), lambda b, t: (0, 0, 0)),            # r_w_bias (resident)
            pl.BlockSpec((n_head, klen, d_head), lambda b, t: (0, 0, 0)),         # r_emb    (resident)
            pl.BlockSpec((n_head, klen), lambda b, t: (0, 0)),                    # r_bias   (resident)
            pl.BlockSpec((1, tq_a, d_model), lambda b, t: (b, t, 0)),             # residual tile (f32)
            pl.BlockSpec((n_head, d_head, d_model), lambda b, t: (0, 0, 0)),      # Wo (resident)
            pl.BlockSpec((1, d_model), lambda b, t: (0, 0)),                      # LN gamma
            pl.BlockSpec((1, d_model), lambda b, t: (0, 0)),                      # LN beta
        ],
        out_specs=pl.BlockSpec((1, tq_a, d_model), lambda b, t: (b, t, 0)),       # lane-dense output
        out_shape=jax.ShapeDtypeStruct((bsz, qlen, d_model), jnp.float32),
        compiler_params=cparams,
    )(q, k, v, rwb, remb, rbias, wt, wo_h, gam, bet)

    return jnp.transpose(out_bqm, (1, 0, 2))                      # back to (qlen, bsz, d_model)


# --------------------------- pure-JAX reference ------------------------------

def reference_forward(w, r_emb, r_w_bias, r_bias, attn_mask, params, n_head, d_head):
    qlen, bsz, d_model = w.shape
    HD = n_head * d_head
    scale = 1.0 / math.sqrt(d_head)
    Wqkv, Wo, gamma, beta = params
    P = lax.Precision.HIGHEST

    heads = jnp.einsum('ibm,mh->ibh', w, Wqkv, precision=P)
    q = heads[..., :HD].reshape(qlen, bsz, n_head, d_head)
    k = heads[..., HD:2 * HD].reshape(qlen, bsz, n_head, d_head)
    v = heads[..., 2 * HD:].reshape(qlen, bsz, n_head, d_head)
    klen = qlen
    r_emb = r_emb[-klen:]
    r_bias = r_bias[-klen:]

    rw_q = q + r_w_bias[None, None]
    AC = jnp.einsum('ibnd,jbnd->ijbn', rw_q, k, precision=P)
    B_ = jnp.einsum('ibnd,jnd->ijbn', q, r_emb, precision=P)
    D_ = r_bias[None, :, None, :]
    x = B_ + D_
    zp = jnp.zeros((qlen, 1, bsz, n_head), x.dtype)
    xp = jnp.concatenate([zp, x], axis=1).reshape(klen + 1, qlen, bsz, n_head)
    BD = xp[1:].reshape(x.shape)

    score = (AC + BD) * scale
    score = jnp.where(attn_mask[:, :, None, None] > 0, -jnp.inf, score)
    prob = jax.nn.softmax(score, axis=1)
    attn_vec = jnp.einsum('ijbn,jbnd->ibnd', prob, v, precision=P).reshape(qlen, bsz, HD)
    attn_out = jnp.einsum('ibh,hm->ibm', attn_vec, Wo, precision=P)
    y = w + attn_out
    mu = y.mean(-1, keepdims=True)
    var = ((y - mu) ** 2).mean(-1, keepdims=True)
    return (y - mu) / jnp.sqrt(var + 1e-5) * gamma + beta


# ------------------------------------ main -----------------------------------

if __name__ == "__main__":
    n_head, d_head, d_model = 2, 16, 32
    qlen, bsz = 8, 2
    klen = qlen

    key = jax.random.PRNGKey(0)
    k_w, k_qkv, k_o, k_re, k_rwb, k_rb = jax.random.split(key, 6)

    w = jax.random.normal(k_w, (qlen, bsz, d_model), jnp.float32)
    Wqkv = 0.1 * jax.random.normal(k_qkv, (d_model, 3 * n_head * d_head), jnp.float32)
    Wo = 0.1 * jax.random.normal(k_o, (n_head * d_head, d_model), jnp.float32)
    gamma = jnp.ones((d_model,), jnp.float32)   # nn.LayerNorm default weight
    beta = jnp.zeros((d_model,), jnp.float32)   # nn.LayerNorm default bias
    r_emb = 0.1 * jax.random.normal(k_re, (klen, n_head, d_head), jnp.float32)
    r_w_bias = 0.1 * jax.random.normal(k_rwb, (n_head, d_head), jnp.float32)
    r_bias = 0.1 * jax.random.normal(k_rb, (klen, n_head), jnp.float32)
    attn_mask = jnp.triu(jnp.ones((qlen, klen), jnp.float32), k=1)   # causal dec_attn_mask

    params = (Wqkv, Wo, gamma, beta)
    out = rel_learnable_mha(w, r_emb, r_w_bias, r_bias, attn_mask, params, n_head, d_head)
    out = jax.block_until_ready(out)

    ref = reference_forward(w, r_emb, r_w_bias, r_bias, attn_mask, params, n_head, d_head)

    assert out.shape == (qlen, bsz, d_model)
    assert bool(jnp.all(jnp.isfinite(out)))
    max_err = float(jnp.max(jnp.abs(out - ref)))
    assert max_err < 5e-2, f"mismatch vs reference: {max_err}"
    print("KERNEL_OK")
</pallas_src>

<mosaic_0001>
module attributes {stable_mosaic.version = 11 : i64} {
  func.func @kernel(%arg0: i32, %arg1: i32, %arg2: memref<1x8x32xf32, #tpu.memory_space<vmem>>, %arg3: memref<32x96xbf16, #tpu.memory_space<vmem>>, %arg4: memref<1x2x8x16xbf16, #tpu.memory_space<vmem>>, %arg5: memref<1x2x8x16xbf16, #tpu.memory_space<vmem>>, %arg6: memref<1x2x8x16xbf16, #tpu.memory_space<vmem>>) attributes {dimension_semantics = [#tpu.dimension_semantics<parallel>, #tpu.dimension_semantics<parallel>], iteration_bounds = array<i64: 2, 1>, scalar_prefetch = 0 : i64, scratch_operands = 0 : i64, tpu.core_type = #tpu.core_type<tc>, window_params = [{transform_indices = @transform_0, window_bounds = array<i64: 1, 8, 32>}, {pipeline_mode = #tpu.pipeline_mode<synchronous>, transform_indices = @transform_1, window_bounds = array<i64: 32, 96>}, {transform_indices = @transform_2, window_bounds = array<i64: 1, 2, 8, 16>}, {transform_indices = @transform_3, window_bounds = array<i64: 1, 2, 8, 16>}, {transform_indices = @transform_4, window_bounds = array<i64: 1, 2, 8, 16>}]} {
    %c0 = arith.constant 0 : index
    %c0_0 = arith.constant 0 : index
    %c0_1 = arith.constant 0 : index
    %0 = vector.load %arg2[%c0, %c0_0, %c0_1] : memref<1x8x32xf32, #tpu.memory_space<vmem>>, vector<1x8x32xf32>
    %1 = vector.shape_cast %0 : vector<1x8x32xf32> to vector<8x32xf32>
    %2 = arith.truncf %1 : vector<8x32xf32> to vector<8x32xbf16>
    %c0_2 = arith.constant 0 : index
    %c0_3 = arith.constant 0 : index
    %3 = vector.load %arg3[%c0_2, %c0_3] : memref<32x96xbf16, #tpu.memory_space<vmem>>, vector<32x96xbf16>
    %cst = arith.constant dense<0.000000e+00> : vector<8x96xf32>
    %4 = tpu.matmul %2, %3, %cst {dimension_numbers = #tpu.dot_dimension_numbers<[1], [0], [0], [1], [0, 0, 1, 1], [], []>} : vector<8x32xbf16>, vector<32x96xbf16>, vector<8x96xf32> -> vector<8x96xf32>
    %5 = arith.truncf %4 : vector<8x96xf32> to vector<8x96xbf16>
    %6 = vector.extract_strided_slice %5 {offsets = [0, 0], sizes = [8, 16], strides = [1, 1]} : vector<8x96xbf16> to vector<8x16xbf16>
    %c0_4 = arith.constant 0 : index
    %c0_5 = arith.constant 0 : index
    %c0_6 = arith.constant 0 : index
    %c0_7 = arith.constant 0 : index
    %7 = vector.load %arg4[%c0_4, %c0_5, %c0_6, %c0_7] : memref<1x2x8x16xbf16, #tpu.memory_space<vmem>>, vector<1x1x8x16xbf16>
    %8 = vector.shape_cast %7 : vector<1x1x8x16xbf16> to vector<8x16xbf16>
    %9 = vector.shape_cast %6 : vector<8x16xbf16> to vector<1x1x8x16xbf16>
    tpu.vector_store %arg4[%c0_4, %c0_5, %c0_6, %c0_7], %9 {strides = array<i32>} : memref<1x2x8x16xbf16, #tpu.memory_space<vmem>>, vector<1x1x8x16xbf16>,
    %10 = vector.extract_strided_slice %5 {offsets = [0, 32], sizes = [8, 16], strides = [1, 1]} : vector<8x96xbf16> to vector<8x16xbf16>
    %c0_8 = arith.constant 0 : index
    %c0_9 = arith.constant 0 : index
    %c0_10 = arith.constant 0 : index
    %c0_11 = arith.constant 0 : index
    %11 = vector.load %arg5[%c0_8, %c0_9, %c0_10, %c0_11] : memref<1x2x8x16xbf16, #tpu.memory_space<vmem>>, vector<1x1x8x16xbf16>
    %12 = vector.shape_cast %11 : vector<1x1x8x16xbf16> to vector<8x16xbf16>
    %13 = vector.shape_cast %10 : vector<8x16xbf16> to vector<1x1x8x16xbf16>
    tpu.vector_store %arg5[%c0_8, %c0_9, %c0_10, %c0_11], %13 {strides = array<i32>} : memref<1x2x8x16xbf16, #tpu.memory_space<vmem>>, vector<1x1x8x16xbf16>,
    %14 = vector.extract_strided_slice %5 {offsets = [0, 64], sizes = [8, 16], strides = [1, 1]} : vector<8x96xbf16> to vector<8x16xbf16>
    %c0_12 = arith.constant 0 : index
    %c0_13 = arith.constant 0 : index
    %c0_14 = arith.constant 0 : index
    %c0_15 = arith.constant 0 : index
    %15 = vector.load %arg6[%c0_12, %c0_13, %c0_14, %c0_15] : memref<1x2x8x16xbf16, #tpu.memory_space<vmem>>, vector<1x1x8x16xbf16>
    %16 = vector.shape_cast %15 : vector<1x1x8x16xbf16> to vector<8x16xbf16>
    %17 = vector.shape_cast %14 : vector<8x16xbf16> to vector<1x1x8x16xbf16>
    tpu.vector_store %arg6[%c0_12, %c0_13, %c0_14, %c0_15], %17 {strides = array<i32>} : memref<1x2x8x16xbf16, #tpu.memory_space<vmem>>, vector<1x1x8x16xbf16>,
    %18 = vector.extract_strided_slice %5 {offsets = [0, 16], sizes = [8, 16], strides = [1, 1]} : vector<8x96xbf16> to vector<8x16xbf16>
    %c0_16 = arith.constant 0 : index
    %c1 = arith.constant 1 : index
    %c0_17 = arith.constant 0 : index
    %c0_18 = arith.constant 0 : index
    %19 = vector.load %arg4[%c0_16, %c1, %c0_17, %c0_18] : memref<1x2x8x16xbf16, #tpu.memory_space<vmem>>, vector<1x1x8x16xbf16>
    %20 = vector.shape_cast %19 : vector<1x1x8x16xbf16> to vector<8x16xbf16>
    %21 = vector.shape_cast %18 : vector<8x16xbf16> to vector<1x1x8x16xbf16>
    tpu.vector_store %arg4[%c0_16, %c1, %c0_17, %c0_18], %21 {strides = array<i32>} : memref<1x2x8x16xbf16, #tpu.memory_space<vmem>>, vector<1x1x8x16xbf16>,
    %22 = vector.extract_strided_slice %5 {offsets = [0, 48], sizes = [8, 16], strides = [1, 1]} : vector<8x96xbf16> to vector<8x16xbf16>
    %c0_19 = arith.constant 0 : index
    %c1_20 = arith.constant 1 : index
    %c0_21 = arith.constant 0 : index
    %c0_22 = arith.constant 0 : index
    %23 = vector.load %arg5[%c0_19, %c1_20, %c0_21, %c0_22] : memref<1x2x8x16xbf16, #tpu.memory_space<vmem>>, vector<1x1x8x16xbf16>
    %24 = vector.shape_cast %23 : vector<1x1x8x16xbf16> to vector<8x16xbf16>
    %25 = vector.shape_cast %22 : vector<8x16xbf16> to vector<1x1x8x16xbf16>
    tpu.vector_store %arg5[%c0_19, %c1_20, %c0_21, %c0_22], %25 {strides = array<i32>} : memref<1x2x8x16xbf16, #tpu.memory_space<vmem>>, vector<1x1x8x16xbf16>,
    %26 = vector.extract_strided_slice %5 {offsets = [0, 80], sizes = [8, 16], strides = [1, 1]} : vector<8x96xbf16> to vector<8x16xbf16>
    %c0_23 = arith.constant 0 : index
    %c1_24 = arith.constant 1 : index
    %c0_25 = arith.constant 0 : index
    %c0_26 = arith.constant 0 : index
    %27 = vector.load %arg6[%c0_23, %c1_24, %c0_25, %c0_26] : memref<1x2x8x16xbf16, #tpu.memory_space<vmem>>, vector<1x1x8x16xbf16>
    %28 = vector.shape_cast %27 : vector<1x1x8x16xbf16> to vector<8x16xbf16>
    %29 = vector.shape_cast %26 : vector<8x16xbf16> to vector<1x1x8x16xbf16>
    tpu.vector_store %arg6[%c0_23, %c1_24, %c0_25, %c0_26], %29 {strides = array<i32>} : memref<1x2x8x16xbf16, #tpu.memory_space<vmem>>, vector<1x1x8x16xbf16>,
    return
  }
  func.func @transform_0(%arg0: i32, %arg1: i32) -> (i32, i32, i32) {
    %c0_i32 = arith.constant 0 : i32
    %c0_i32_0 = arith.constant 0 : i32
    return %arg0, %arg1, %c0_i32 : i32, i32, i32
  }
  func.func @transform_1(%arg0: i32, %arg1: i32) -> (i32, i32) {
    %c0_i32 = arith.constant 0 : i32
    %c0_i32_0 = arith.constant 0 : i32
    %c0_i32_1 = arith.constant 0 : i32
    return %c0_i32, %c0_i32_0 : i32, i32
  }
  func.func @transform_2(%arg0: i32, %arg1: i32) -> (i32, i32, i32, i32) {
    %c0_i32 = arith.constant 0 : i32
    %c0_i32_0 = arith.constant 0 : i32
    %c0_i32_1 = arith.constant 0 : i32
    return %arg0, %c0_i32, %arg1, %c0_i32_0 : i32, i32, i32, i32
  }
  func.func @transform_3(%arg0: i32, %arg1: i32) -> (i32, i32, i32, i32) {
    %c0_i32 = arith.constant 0 : i32
    %c0_i32_0 = arith.constant 0 : i32
    %c0_i32_1 = arith.constant 0 : i32
    return %arg0, %c0_i32, %arg1, %c0_i32_0 : i32, i32, i32, i32
  }
  func.func @transform_4(%arg0: i32, %arg1: i32) -> (i32, i32, i32, i32) {
    %c0_i32 = arith.constant 0 : i32
    %c0_i32_0 = arith.constant 0 : i32
    %c0_i32_1 = arith.constant 0 : i32
    return %arg0, %c0_i32, %arg1, %c0_i32_0 : i32, i32, i32, i32
  }
}

</mosaic_0001>

<bundles_post_ra>
// kernel: tpu_custom_call.1
= control target key start
LH: loop header
LB: loop body
LE: loop exit
PB: predicated region body
PF: predicated region fallthrough
CT: control target
= control target key end

     0   :  { %s1268_s0 = inlined_call_operand.hbm [shape: f32[2,8,32], index: 0, kind: input, shape index: {}]   ;;  %s1269_s1 = inlined_call_operand.hbm [shape: bf16[32,96], index: 1, kind: input, shape index: {}]   ;;  %s1270_s2 = inlined_call_operand.hbm [shape: bf16[2,2,8,16], index: 2, kind: output, shape index: {0}]   ;;  %s1271_s3 = inlined_call_operand.hbm [shape: bf16[2,2,8,16], index: 3, kind: output, shape index: {1}]   ;;  %s1272_s4 = inlined_call_operand.hbm [shape: bf16[2,2,8,16], index: 4, kind: output, shape index: {2}]  }
   0x1   :  { %1279 = sst [smem:[#allocation15_spill]] %s1268_s0 }
   0x2   :  { %1280 = sst [smem:[#allocation16_spill]] %s1269_s1 }
   0x3   :  { %10 = vsyncpa [#allocation3], 0 }
   0x4   :  { %12 = vsyncpa [#allocation3 + $0x1], 0 }
   0x5   :  { %13 = vsyncpa [#allocation6], 0 }
   0x6   :  { %14 = vsyncpa [#allocation4], 0 }
   0x7   :  { %16 = vsyncpa [#allocation4 + $0x1], 0 }
   0x8   :  { %17 = vsyncpa [#allocation9], 0 }
   0x9   :  { %19 = vsyncpa [#allocation9 + $0x1], 0  ;;  %s964_s15 = smov 0   ;;  %s966_s16 = smov 0  }
   0xa   :  { %s968_s17 = smov 0   ;;  %s970_s18 = smov 0  }
   0xb   :  { %s972_s19 = smov 0   ;;  %s974_s20 = smov 0  }
   0xc LB: > { %s995_s21 = sadd.s32 4294967295, %s922_s20   ;;  %s1276_s22 = sadd.s32 4294967294, %s922_s20   ;;  %s922_s20 = sphi %s974_s20, %s25_s20   ;;  %s918_s19 = sphi %s972_s19, %s1303_s19   ;;  %s914_s18 = sphi %s970_s18, %s1302_s18   ;;  %s910_s17 = sphi %s968_s17, %s1301_s17   ;;  %s906_s16 = sphi %s966_s16, %s1300_s16   ;;  %s902_s15 = sphi %s964_s15, %s1299_s15  }
   0xd   : > { %p59_p0 = scmp.ne.s32.totalorder %s906_s16, %s902_s15  ;;  %p1273_p1 = scmp.eq.s32.totalorder %s995_s21, 0 }
   0xe   : > { %p112_p3 = scmp.eq.s32.totalorder %s1276_s22, 1  ;;  %p579_p5 = scmp.ge.s32.totalorder %s922_s20, 1 }
   0xf   : > { %p1006_p4 = por %p1273_p1, %p59_p0  ;;  %p175_p7 = scmp.lt.s32.totalorder %s922_s20, 3 }
  0x10   : > { %p1011_p6 = por %p112_p3, %p59_p0  ;;  %s924_s26 = smov [#allocation5]  }
  0x11   : > { %s1281_s23 = scalar_select %p1006_p4, 1, 0 }
  0x12   : > { %s1282_s24 = scalar_select %p1011_p6, 1, 0 }
  0x13   : > { %p1016_p8 = pnand %p579_p5, %p175_p7  ;;  %s187_s27 = sshll.u32 %s924_s26, 4  ;;  %s188_s27 = int_to_ptr.vmem [resolvable:$true] %s187_s27 }
  0x14   : > { %s37_s29 = sadd.s32 1, %s918_s19  ;;  %s1285_s1 = sld [smem:[#allocation16_spill]] }
  0x15   : > { %s1283_s25 = scalar_select %p1016_p8, 1, 0 }
  0x16   : > { %p635_p9 = pneg %p1016_p8 }
  0x18   : > { %p1025_p11 = pnand %p635_p9, %p1273_p1 }
  0x1a   : > { %s718_s6 = scalar_lea.hbm %s1285_s1, 256  ;;  %p720_p13 = pneg %p1025_p11 }
  0x1b   : > { %p719_p12 = scmp.ne.s32.totalorder %s1285_s1, %s718_s6  ;;  %p725_p5 = scmp.lt.u32.totalorder %s718_s6, %s1285_s1 }
  0x1d   : > { %p721_p0 = pnand %p720_p13, %p719_p12 }
  0x1f   : > { %p722_p3 = pneg %p721_p0 }
  0x21   : > { %p727_p7 = pnand %p725_p5, %p722_p3 }
  0x23   : > { %730 = shalt.err (!%p727_p7)
}
  0x24   : > { %s731_s11 = scalar_lea.vmem %s188_s27, 256  ;;  %p739_p2 = scmp.lt.s32.totalorder %s188_s27, %s188_s27 }
  0x25   : > { %p732_p9 = scmp.ne.s32.totalorder %s188_s27, %s731_s11  ;;  %p740_p6 = scmp.lt.s32.totalorder %s731_s11, %s731_s11 }
  0x27   : > { %p734_p10 = pnand %p732_p9, %p720_p13  ;;  %p741_p4 = por %p740_p6, %p739_p2 }
  0x29   : > { %p735_p1 = pneg %p734_p10 }
  0x2b   : > { %p742_p8 = pnand %p741_p4, %p735_p1 }
  0x2d   : > { %745 = shalt.err (!%p742_p8)
}
  0x2e   : > { %s925_s12 = smov 64   ;;  %s926_s13 = smov 4  }
  0x2f   : > { %638 = dma.hbm_to_vmem [thread:$0]  (!%p1025_p11), %s1285_s1, 256, %s188_s27, [#allocation6], %s925_s12, %s925_s12, %s926_s13  }
  0x30   : > { %p39_p1 = scmp.ge.s32.totalorder %s37_s29, 2  ;;  %s46_s30 = sadd.s32 1, %s910_s17 }
  0x31   : > { %p53_p2 = scmp.ne.s32.totalorder %s910_s17, %s906_s16  ;;  %p54_p4 = scmp.eq.s32.totalorder %s922_s20, 0 }
  0x32   : > { %s1305_s29 = smov (%p39_p1, %s37_s29), 0  ;;  %p1287_p8 = scmp.eq.s32.totalorder %s995_s21, 1 }
  0x33   : > { %p1052_p6 = por %p54_p4, %p53_p2  ;;  %s41_s28 = ssub.s32 %s918_s19, %s1305_s29 }
  0x34   : > { %p1058_p10 = por %p1287_p8, %p53_p2  ;;  %p654_p12 = scmp.lt.s32.totalorder %s922_s20, 2 }
  0x35   : > { %p44_p11 = scmp.eq.s32.totalorder %s41_s28, 0  ;;  %s201_s27 = sand.u32 1, %s910_s17  }
  0x36   : > { %s582_s7 = sshll.u32 %s201_s27, 3  ;;  %s583_s9 = sshll.u32 %s918_s19, 7 }
  0x37   : > { %s1067_s8 = scalar_select %p44_p11, %s910_s17, %s46_s30  }
  0x38   : > { %s1289_s0 = sld [smem:[#allocation15_spill]]  ;;  %s205_s13 = scalar_lea.vmem [#allocation2], %s582_s7 }
  0x39   : > { %s213_s14 = sshll.u32 %s205_s13, 4  ;;  %p1079_p13 = pnand %p654_p12, %p1052_p6  ;;  %s1075_s14 = int_to_ptr.vmem [resolvable:$true] %s213_s14 }
  0x3a   : > { %s202_s30 = scalar_lea.sflag [#allocation3], %s201_s27 }
  0x3b   : > { %p748_p3 = pneg %p1079_p13 }
  0x3e   : > { %s1073_s12 = scalar_lea.hbm %s1289_s0, %s583_s9  ;;  %s751_s10 = scalar_lea.hbm %s1289_s0, 256 }
  0x3f   : > { %s746_s28 = scalar_lea.hbm %s1073_s12, 128  ;;  %p752_p9 = scmp.lt.u32.totalorder %s1073_s12, %s1289_s0 }
  0x40   : > { %p747_p0 = scmp.ne.s32.totalorder %s1073_s12, %s746_s28  ;;  %p753_p1 = scmp.lt.u32.totalorder %s751_s10, %s746_s28 }
  0x41   : > { %p755_p4 = scmp.lt.u32.totalorder %s746_s28, %s1073_s12 }
  0x42   : > { %p749_p5 = pnand %p748_p3, %p747_p0  ;;  %p754_p2 = por %p753_p1, %p752_p9 }
  0x44   : > { %p750_p7 = pneg %p749_p5  ;;  %p756_p6 = por %p755_p4, %p754_p2 }
  0x46   : > { %p757_p8 = pnand %p756_p6, %p750_p7 }
  0x48   : > { %760 = shalt.err (!%p757_p8)
}
  0x49   : > { %s761_s27 = scalar_lea.vmem %s1075_s14, 128  ;;  %s927_s13 = smov [#allocation2]  }
  0x4a   : > { %p762_p12 = scmp.ne.s32.totalorder %s1075_s14, %s761_s27  ;;  %s766_s7 = sshll.u32 %s927_s13, 4  ;;  %s767_s7 = int_to_ptr.vmem [resolvable:$false] %s766_s7 }
  0x4b   : > { %s768_s9 = scalar_lea.vmem %s767_s7, 256  ;;  %p769_p5 = scmp.lt.s32.totalorder %s1075_s14, %s767_s7 }
  0x4c   : > { %p764_p11 = pnand %p762_p12, %p748_p3  ;;  %p770_p9 = scmp.lt.s32.totalorder %s768_s9, %s761_s27 }
  0x4e   : > { %p765_p0 = pneg %p764_p11  ;;  %p771_p1 = por %p770_p9, %p769_p5 }
  0x50   : > { %p772_p2 = pnand %p771_p1, %p765_p0 }
  0x52   : > { %775 = shalt.err (!%p772_p2)
}
  0x53   : > { %642 = dma.hbm_to_vmem [thread:$0]  (!%p1079_p13), %s1073_s12, 128, %s1075_s14, %s202_s30  }
  0x54   : > { %p1291_p7 = scmp.ne.s32.totalorder %s1283_s25, 0 }
  0x55   : > { %s1111_s28 = sand.u32 (!%p1291_p7), 1, %s906_s16   ;;  %p1292_p3 = scmp.ne.s32.totalorder (!%p1291_p7), %s1281_s23, 0 }
  0x56   : > { %222 = sbr.rel (%p1291_p7) target bundleno = 499 (0x1f3), region = 28  ;;  %s1114_s10 = sshll.u32 (!%p1291_p7), %s1111_s28, 3 }
  0x57   : > { %s225_s5 = scalar_lea.sflag (!%p1291_p7), [#allocation3], %s1111_s28  ;;  %s228_s11 = scalar_lea.vmem (!%p1291_p7), [#allocation2], %s1114_s10 }
  0x5d   : > { %885 = dma.done.wait (%p1292_p3), %s225_s5, 128  }
  0x5e   : > { %887 = vsyncadd (%p1292_p3), %s225_s5, 4294967168  ;;  %p1293_p13 = scmp.eq.s32.totalorder %s995_s21, 0 }
  0x60   : > { %889 = dma.done.wait (%p1293_p13), [#allocation6], 256   ;;  %p1294_p4 = pmov %p1293_p13 }
  0x61   : > { %v928_v0 = vmov 0.0   ;;  %vm929_vm0 = vmmov 0   ;;  %v716_v1 = vld [vmem:[#allocation5] sm:$0xff]   ;;  %v717_v2 = vld [vmem:[#allocation5 + $0x8] sm:$0xff]   ;;  %v268_v3 = vld [vmem:[%s228_s11] sm:$0xff]  ;;  %vm286_vm1 = vcmask 261120  }
  0x62   : > { %891 = vsyncadd (%p1294_p4), [#allocation6], 4294967040  ;;  %615 = vmatprep.subr.bf16.mxu0 %v928_v0  ;;  %619 = vmatprep.mubr.msk.bf16.mxu0 %vm929_vm0, %v928_v0  ;;  %v269_v4 = vpack.c.bf16 %v268_v3, %v268_v3  ;;  %vm331_vm2 = vcmask 125952   ;;  %s1277_s23 = smov 64   ;;  %s931_s25 = smov 96  }
  0x63   : > { %616 = vmatpush3.bf16.msra.mxu0 %v716_v1  ;;  %s252_s12 = scalar_lea.vmem [#allocation7], %s1114_s10  ;;  %s932_s14 = smov 112  }
  0x64   : > { %617 = vmatprep.subr.bf16.mxu0 %v928_v0  ;;  %s933_s26 = smov 80   ;;  %s934_s30 = smov 48  }
  0x65   : > { %s259_s27 = scalar_lea.vmem [#allocation8], %s1114_s10  ;;  %s384_s7 = sshll.u32 %s252_s12, 4  ;;  %s1141_s7 = int_to_ptr.vmem [resolvable:$true] %s384_s7 }
  0x66   : > { %s401_s13 = sshll.u32 %s259_s27, 4  ;;  %s364_s9 = sand.u32 1, %s995_s21   ;;  %s1138_s13 = int_to_ptr.vmem [resolvable:$true] %s401_s13 }
  0x67   : > { %618 = vmatpush3.bf16.msra.mxu0 %v717_v2  ;;  %s609_s5 = sshll.u32 %s914_s18, 7  ;;  %s1133_s11 = scalar_lea.vmem [#allocation10], %s1114_s10 }
  0x68   : > { %s1146_s18 = scalar_lea.hbm %s1271_s3, %s609_s5  ;;  %s1160_s21 = scalar_lea.hbm %s1272_s4, %s609_s5 }
  0x69   : > { %s776_s0 = scalar_lea.vmem %s1138_s13, 128  ;;  %s935_s10 = smov [#allocation8]  }
  0x6a   : > { %620 = vmatmul.mubr.msk.bf16.vlgmr.msra.gmra.mrb[0].mxu0 %vm286_vm1, %v269_v4  ;;  %p777_p6 = scmp.ne.s32.totalorder %s1138_s13, %s776_s0 }
  0x6c   : > { %p778_p8 = pnand %p777_p6, %p1058_p10 }
  0x6e   : > { %p779_p12 = pneg %p778_p8 }
 0x13d   : > { %v324_v5 = vpop.f32.mrb[0].mxu0 }
 0x13e   : > { %v330_v6 = vpack.c.bf16 %v324_v5, %v324_v5  ;;  %v621_v7 = vpop.f32.mrb[1].mxu0 }
 0x13f   : > { %v327_v8 = vpop.f32.mrb[2].mxu0 }
 0x140   : > { %340 = vrot.lane.b32.xlu1 %v330_v6, %s1277_s23  ;;  %336 = vrot.lane.b32.xlu0 %v330_v6, %s931_s25  ;;  %v622_v9 = vpop.f32.mrb[3].mxu0  ;;  %332 = vst.msk [vmem:[%s252_s12] sm:$0xf] %vm331_vm2, %v330_v6  ;;  %s418_s25 = sshll.u32 %s1133_s11, 4  ;;  %s1153_s25 = int_to_ptr.vmem [resolvable:$true] %s418_s25 }
 0x144   : > { %344 = vrot.lane.b32.xlu1 %v330_v6, %s932_s14  ;;  %349 = vrot.lane.b32.xlu0 %v330_v6, %s933_s26  ;;  %s1162_s14 = scalar_lea.sflag [#allocation9], %s364_s9  ;;  %s780_s26 = sshll.u32 %s935_s10, 4  ;;  %s781_s26 = int_to_ptr.vmem [resolvable:$false] %s780_s26 }
 0x145   : > { %s782_s1 = scalar_lea.vmem %s781_s26, 256  ;;  %p783_p11 = scmp.lt.s32.totalorder %s1138_s13, %s781_s26 }
 0x146   : > { %p784_p0 = scmp.lt.s32.totalorder %s782_s1, %s776_s0 }
 0x148   : > { %354 = vrot.lane.b32.xlu0 %v330_v6, %s934_s30  ;;  %s1151_s30 = scalar_lea.hbm %s1270_s2, %s609_s5  ;;  %p785_p5 = por %p784_p0, %p783_p11 }
 0x14a   : > { %p786_p9 = pnand %p785_p5, %p779_p12 }
 0x1b2   : > { %v341_v10 = vpop.permute.xlu1 %340  ;;  %v337_v11 = vpop.permute.xlu0 %336 }
 0x1b3   : > { %343 = vst.msk [vmem:[%s1133_s11] sm:$0xf] %vm331_vm2, %v341_v10  ;;  %339 = vst.msk [vmem:[%s259_s27] sm:$0xf] %vm331_vm2, %v337_v11 }
 0x1b6   : > { %v345_v12 = vpop.permute.xlu1 %344  ;;  %v350_v13 = vpop.permute.xlu0 %349 }
 0x1b7   : > { %594 = vst.msk [vmem:[%s252_s12 + $0x4] sm:$0xf] %vm331_vm2, %v345_v12  ;;  %595 = vst.msk [vmem:[%s259_s27 + $0x4] sm:$0xf] %vm331_vm2, %v350_v13 }
 0x1b8   : > { %789 = shalt.err (!%p786_p9)
}
 0x1b9   : > { %s790_s22 = scalar_lea.hbm %s1146_s18, 128  ;;  %s794_s27 = scalar_lea.hbm %s1271_s3, 256 }
 0x1ba   : > { %p791_p1 = scmp.ne.s32.totalorder %s1146_s18, %s790_s22  ;;  %p795_p3 = scmp.lt.u32.totalorder %s1146_s18, %s1271_s3 }
 0x1bb   : > { %p796_p13 = scmp.lt.u32.totalorder %s794_s27, %s790_s22  ;;  %p798_p6 = scmp.lt.u32.totalorder %s790_s22, %s1146_s18 }
 0x1bc   : > { %p792_p2 = pnand %p791_p1, %p1058_p10 }
 0x1bd   : > { %p797_p4 = por %p796_p13, %p795_p3 }
 0x1be   : > { %p793_p7 = pneg %p792_p2 }
 0x1bf   : > { %p799_p8 = por %p798_p6, %p797_p4 }
 0x1c1   : > { %p800_p12 = pnand %p799_p8, %p793_p7 }
 0x1c3   : > { %803 = shalt.err (!%p800_p12)
}
 0x1c4   : > { %s936_s0 = smov 4   ;;  %s1295_s1 = smov 64  }
 0x1c5   : > { %630 = dma.vmem_to_hbm [thread:$0]  (%p1058_p10), %s1138_s13, 128, %s1146_s18, %s1162_s14, %s1295_s1, %s1295_s1, %s936_s0  }
 0x1c6   : > { %s360_s10 = scalar_lea.sflag [#allocation4], %s1111_s28  ;;  %s804_s26 = scalar_lea.vmem %s1141_s7, 128 }
 0x1c7   : > { %p805_p11 = scmp.ne.s32.totalorder %s1141_s7, %s804_s26  ;;  %s937_s22 = smov [#allocation7]  }
 0x1c8   : > { %s808_s23 = sshll.u32 %s937_s22, 4  ;;  %s809_s23 = int_to_ptr.vmem [resolvable:$false] %s808_s23 }
 0x1c9   : > { %p806_p0 = pnand %p805_p11, %p1058_p10  ;;  %s810_s12 = scalar_lea.vmem %s809_s23, 256 }
 0x1ca   : > { %p811_p9 = scmp.lt.s32.totalorder %s1141_s7, %s809_s23  ;;  %p812_p1 = scmp.lt.s32.totalorder %s810_s12, %s804_s26 }
 0x1cb   : > { %p807_p5 = pneg %p806_p0 }
 0x1cc   : > { %p813_p2 = por %p812_p1, %p811_p9 }
 0x1ce   : > { %p814_p7 = pnand %p813_p2, %p807_p5 }
 0x1d0   : > { %817 = shalt.err (!%p814_p7)
}
 0x1d1   : > { %s818_s13 = scalar_lea.hbm %s1151_s30, 128  ;;  %s822_s9 = scalar_lea.hbm %s1270_s2, 256 }
 0x1d2   : > { %p819_p3 = scmp.ne.s32.totalorder %s1151_s30, %s818_s13  ;;  %p823_p6 = scmp.lt.u32.totalorder %s1151_s30, %s1270_s2 }
 0x1d3   : > { %p824_p8 = scmp.lt.u32.totalorder %s822_s9, %s818_s13  ;;  %p826_p11 = scmp.lt.u32.totalorder %s818_s13, %s1151_s30 }
 0x1d4   : > { %p820_p13 = pnand %p819_p3, %p1058_p10 }
 0x1d5   : > { %p825_p12 = por %p824_p8, %p823_p6 }
 0x1d6   : > { %p821_p4 = pneg %p820_p13 }
 0x1d7   : > { %p827_p0 = por %p826_p11, %p825_p12 }
 0x1d9   : > { %p828_p5 = pnand %p827_p0, %p821_p4 }
 0x1db   : > { %831 = shalt.err (!%p828_p5)
}
 0x1dc   : > { %629 = dma.vmem_to_hbm [thread:$0]  (%p1058_p10), %s1141_s7, 128, %s1151_s30, %s360_s10, %s1295_s1, %s1295_s1, %s936_s0   ;;  %v355_v14 = vpop.permute.xlu0 %354 }
 0x1dd   : > { %596 = vst.msk [vmem:[%s1133_s11 + $0x4] sm:$0xf] %vm331_vm2, %v355_v14  ;;  %s832_s26 = scalar_lea.vmem %s1153_s25, 128  ;;  %s938_s23 = smov [#allocation10]  }
 0x1de   : > { %p833_p9 = scmp.ne.s32.totalorder %s1153_s25, %s832_s26  ;;  %s836_s12 = sshll.u32 %s938_s23, 4  ;;  %s837_s12 = int_to_ptr.vmem [resolvable:$false] %s836_s12 }
 0x1df   : > { %s838_s28 = scalar_lea.vmem %s837_s12, 256  ;;  %p839_p7 = scmp.lt.s32.totalorder %s1153_s25, %s837_s12 }
 0x1e0   : > { %p834_p1 = pnand %p833_p9, %p1058_p10  ;;  %p840_p3 = scmp.lt.s32.totalorder %s838_s28, %s832_s26 }
 0x1e2   : > { %p835_p2 = pneg %p834_p1  ;;  %p841_p13 = por %p840_p3, %p839_p7 }
 0x1e4   : > { %p842_p4 = pnand %p841_p13, %p835_p2 }
 0x1e6   : > { %845 = shalt.err (!%p842_p4)
}
 0x1e7   : > { %s846_s7 = scalar_lea.hbm %s1160_s21, 128  ;;  %s850_s10 = scalar_lea.hbm %s1272_s4, 256 }
 0x1e8   : > { %p847_p6 = scmp.ne.s32.totalorder %s1160_s21, %s846_s7  ;;  %p851_p11 = scmp.lt.u32.totalorder %s1160_s21, %s1272_s4 }
 0x1e9   : > { %p852_p0 = scmp.lt.u32.totalorder %s850_s10, %s846_s7  ;;  %p854_p9 = scmp.lt.u32.totalorder %s846_s7, %s1160_s21 }
 0x1ea   : > { %p848_p8 = pnand %p847_p6, %p1058_p10 }
 0x1eb   : > { %p853_p5 = por %p852_p0, %p851_p11 }
 0x1ec   : > { %p849_p12 = pneg %p848_p8 }
 0x1ed   : > { %p855_p1 = por %p854_p9, %p853_p5 }
 0x1ef   : > { %p856_p2 = pnand %p855_p1, %p849_p12 }
 0x1f1   : > { %859 = shalt.err (!%p856_p2)
}
 0x1f2   : > { %631 = dma.vmem_to_hbm [thread:$0]  (%p1058_p10), %s1153_s25, 128, %s1160_s21, %s1162_s14, %s1295_s1, %s1295_s1, %s936_s0  }
 0x1f3 PF: > { %s433_s27 = sand.u32 1, %s902_s15   ;;  %p1296_p7 = scmp.ne.s32.totalorder %s1282_s24, 0 }
 0x1f4   : > { %p1297_p3 = scmp.ge.s32.totalorder %s922_s20, 2  ;;  %s434_s9 = scalar_lea.sflag [#allocation4], %s433_s27 }
 0x1f6   : > { %p644_p13 = pnand %p1297_p3, %p1296_p7 }
 0x1f8   : > { %893 = dma.done.wait (!%p644_p13), %s434_s9, 128  }
 0x1f9   : > { %895 = vsyncadd (!%p644_p13), %s434_s9, 4294967168  ;;  %s1298_s6 = sadd.s32 4294967294, %s922_s20  }
 0x1fa   : > { %s442_s5 = sand.u32 1, %s1298_s6  }
 0x1fb   : > { %s443_s22 = scalar_lea.sflag [#allocation9], %s442_s5 }
 0x1fc   : > { %897 = dma.done.wait (!%p644_p13), %s443_s22, 256  }
 0x1fd   : > { %899 = vsyncadd (!%p644_p13), %s443_s22, 4294967040  ;;  %s25_s20 = sadd.s32 1, %s922_s20   ;;  %s1299_s15 = smov %s906_s16 }
 0x1fe   : > { %p22_p10 = scmp.ge.s32.totalorder %s25_s20, 4   ;;  %s1300_s16 = smov %s910_s17 }
 0x1ff   : > { %s1301_s17 = smov %s1067_s8  ;;  %s1302_s18 = smov %s918_s19 }
 0x200   : > { %s1303_s19 = smov %s1305_s29  ;;  %24 = sbr.rel (!%p22_p10) target bundleno = 12 (0xc), region = 112 }
 0x207   :  { %457 = vsyncpa [#allocation3], 1 }
 0x208   :  { %459 = vsyncpa [#allocation3 + $0x1], 1 }
 0x209   :  { %460 = vsyncpa [#allocation6], 1 }
 0x20a   :  { %461 = vsyncpa [#allocation4], 1 }
 0x20b   :  { %463 = vsyncpa [#allocation4 + $0x1], 1 }
 0x20c   :  { %464 = vsyncpa [#allocation9], 1 }
 0x20d   :  { %466 = vsyncpa [#allocation9 + $0x1], 1 }

</bundles_post_ra>
